<compile_context>
chip_gen: v7x
topology: tpu7x:2x2x1
jax: 0.10.0
libtpu: 0.0.40
codegen_flags: <defaults>
</compile_context>

<pallas_src>
import functools

import jax
import jax.numpy as jnp
from jax.experimental import pallas as pl
from jax.experimental.pallas import tpu as pltpu


_LANE = 128      # vreg lane width / last-dim tile
_SUBLANE = 8     # second-to-last-dim tile for f32


def _round_up(x, m):
    return (x + m - 1) // m * m


def _apply_activation(y, activation):
    if activation == "relu":
        return jnp.maximum(y, 0.0)
    if activation == "sigmoid":
        return jax.nn.sigmoid(y)
    if activation == "leaky_relu":
        return jnp.where(y >= 0.0, y, 0.01 * y)   # PyTorch default slope 0.01
    if activation == "tanh":
        return jnp.tanh(y)
    raise AssertionError(f"Unknown activation {activation}")


def _deep_layer_kernel(*refs, n_layers, activation, compute_dtype):
    """refs = (x_tile, w0, b0, w1, b1, ..., w_{L-1}, b_{L-1}, out_tile).

    One invocation per batch tile; intermediate activations are carried as
    values (vregs / VMEM) across the unrolled layer loop, never touching HBM.
    """
    x_ref = refs[0]
    o_ref = refs[-1]

    y = x_ref[...]                                     # (TM, K0p), compute_dtype
    for i in range(n_layers):
        w = refs[1 + 2 * i][...]                       # (Kp, Np) compute_dtype
        b = refs[2 + 2 * i][...]                       # (1,  Np) f32
        # MXU: compute_dtype operands, f32 accumulate.
        acc = jnp.dot(y, w, preferred_element_type=jnp.float32)
        # VPU/EUP epilogue in f32 (bias broadcast + activation).
        act = _apply_activation(acc + b, activation)
        if i + 1 < n_layers:
            y = act.astype(compute_dtype)
        else:
            o_ref[...] = act.astype(o_ref.dtype)       # lane-dense store


def prepare_deep_layer_params(params, compute_dtype=jnp.bfloat16):
    """One-time padding + cast of params (hoisted out of the forward pass).

    params: list of (w (K, N), b (1, N)).
    Returns (padded_params, out_dim): weights zero-padded to lane multiples and
    cast to compute_dtype, biases zero-padded in f32.
    """
    padded = []
    cur_in_p = None
    for (w, b) in params:
        k, n = w.shape
        assert b.shape == (1, n)
        k_p = _round_up(k, _LANE) if cur_in_p is None else cur_in_p
        n_p = _round_up(n, _LANE)
        w_p = jnp.zeros((k_p, n_p), compute_dtype).at[:k, :n].set(
            w.astype(compute_dtype))
        b_p = jnp.zeros((1, n_p), jnp.float32).at[:, :n].set(
            b.astype(jnp.float32))
        padded.append((w_p, b_p))
        cur_in_p = n_p
    out_dim = params[-1][0].shape[1]
    return padded, out_dim


@functools.partial(jax.jit,
                   static_argnames=("out_dim", "activation", "compute_dtype"))
def deep_layer_forward(x, padded_params, out_dim,
                       activation="relu", compute_dtype=jnp.bfloat16):
    """Fused DeepLayer forward.

    x: (B, size); padded_params: output of prepare_deep_layer_params.
    """
    B, in_dim = x.shape
    in_p = padded_params[0][0].shape[0]
    assert in_p == _round_up(in_dim, _LANE)
    widths_p = [w.shape[1] for (w, _) in padded_params]
    out_p = widths_p[-1]
    n_layers = len(padded_params)
    cd_itemsize = jnp.dtype(compute_dtype).itemsize

    # ---- VMEM budget / batch-tile selection ------------------------------
    weight_bytes = sum(int(w.size) * w.dtype.itemsize for (w, _) in padded_params)
    bias_bytes = sum(int(b.size) * b.dtype.itemsize for (_, b) in padded_params)
    max_wide = max([in_p] + widths_p)
    per_row = (2 * in_p * cd_itemsize                  # double-buffered x tile
               + 2 * out_p * x.dtype.itemsize          # double-buffered out tile
               + 2 * max_wide * 4)                     # f32 carry / matmul temps
    budget = 40 * 1024 * 1024                          # headroom under v7x 64 MiB
    avail = budget - 2 * (weight_bytes + bias_bytes)
    tm_cap = max(8, min(512, avail // per_row) // 8 * 8) if avail > 8 * per_row else 8
    if B >= 512 and tm_cap >= 512:
        tile_m = 512                                   # fills 2x256x256 MXU (v6e/v7x)
    elif B >= 256 and tm_cap >= 256:
        tile_m = 256
    else:
        tile_m = min(_round_up(B, _SUBLANE), tm_cap)
    Bp = _round_up(B, tile_m)
    n_blocks = Bp // tile_m

    # Zero-pad + cast input once; padded cols stay inert (padded weight rows = 0).
    x_p = jnp.zeros((Bp, in_p), compute_dtype).at[:B, :in_dim].set(
        x.astype(compute_dtype))

    # ---- specs ------------------------------------------------------------
    in_specs = [pl.BlockSpec((tile_m, in_p), lambda i: (i, 0))]
    flat_params = []
    for (w_p, b_p) in padded_params:
        in_specs.append(pl.BlockSpec(w_p.shape, lambda i: (0, 0)))   # resident
        in_specs.append(pl.BlockSpec(b_p.shape, lambda i: (0, 0)))   # resident
        flat_params += [w_p, b_p]
    out_specs = pl.BlockSpec((tile_m, out_p), lambda i: (i, 0))

    flops = 2 * Bp * sum(w.shape[0] * w.shape[1] for (w, _) in padded_params)
    transcendentals = (Bp * sum(widths_p)
                       if activation in ("sigmoid", "tanh") else 0)
    bytes_accessed = (int(x_p.size) * x_p.dtype.itemsize
                      + weight_bytes + bias_bytes
                      + Bp * out_p * x.dtype.itemsize)

    vmem_needed = 2 * (weight_bytes + bias_bytes) + tile_m * per_row
    vmem_limit = int(min(max(2 * vmem_needed, 32 * 1024 * 1024),
                         48 * 1024 * 1024))

    kernel = functools.partial(
        _deep_layer_kernel,
        n_layers=n_layers,
        activation=activation,
        compute_dtype=compute_dtype,
    )

    y_p = pl.pallas_call(
        kernel,
        out_shape=jax.ShapeDtypeStruct((Bp, out_p), x.dtype),
        grid=(n_blocks,),
        in_specs=in_specs,
        out_specs=out_specs,
        compiler_params=pltpu.CompilerParams(
            dimension_semantics=("parallel",),       # megacore sharding on v7x
            vmem_limit_bytes=vmem_limit,
        ),
        cost_estimate=pl.CostEstimate(
            flops=flops,
            transcendentals=transcendentals,
            bytes_accessed=bytes_accessed,
        ),
    )(x_p, *flat_params)

    return y_p[:B, :out_dim]


def init_deep_layer_params(key, size, n_layers, d_factor, dtype=jnp.float32):
    """Deterministic params mimicking PyTorch nn.Linear init U[-1/sqrt(in), 1/sqrt(in)]."""
    if not isinstance(d_factor, list):
        d_factor = [d_factor] * n_layers
    params = []
    in_dim = size
    for i in range(n_layers):
        out_dim = int(in_dim // d_factor[i])
        key, kw, kb = jax.random.split(key, 3)
        bound = 1.0 / jnp.sqrt(jnp.array(in_dim, dtype=jnp.float32))
        w = jax.random.uniform(kw, (in_dim, out_dim), dtype=dtype,
                               minval=-bound, maxval=bound)
        b = jax.random.uniform(kb, (1, out_dim), dtype=dtype,
                               minval=-bound, maxval=bound)
        params.append((w, b))
        in_dim = out_dim
    return params


def deep_layer_reference(x, params, activation="relu"):
    """Pure-JAX reference (all supported activations)."""
    y = x
    for w, b in params:
        y = _apply_activation(jnp.dot(y, w) + b, activation)
    return y


if __name__ == "__main__":
    # DeepLayer(size=32, n_layers=3, d_factor=2): features 32 -> 16 -> 8 -> 4, batch = 8.
    size, n_layers, d_factor = 32, 3, 2
    batch = 8

    key = jax.random.PRNGKey(0)
    key, kx = jax.random.split(key)
    x = jax.random.normal(kx, (batch, size), dtype=jnp.float32)

    params = init_deep_layer_params(key, size, n_layers, d_factor)
    out_features = size // (d_factor ** n_layers)

    # One-time parameter preparation (padding + cast hoisted out of forward).
    params_f32, out_dim = prepare_deep_layer_params(params, compute_dtype=jnp.float32)
    params_bf16, _ = prepare_deep_layer_params(params, compute_dtype=jnp.bfloat16)

    # f32 compute path vs. pure-JAX reference (moderate tolerance: Mosaic may
    # lower f32 matmuls via multi-pass bf16).
    y_ref = deep_layer_reference(x, params, activation="relu")
    y_f32 = deep_layer_forward(x, params_f32, out_dim, activation="relu",
                               compute_dtype=jnp.float32)
    y_f32 = jax.block_until_ready(y_f32)
    assert y_f32.shape == (batch, out_features)
    assert jnp.allclose(y_f32, y_ref, atol=1e-4, rtol=1e-4), "f32 path mismatch"

    # Default fast path: bf16 MXU operands + f32 accumulate (relaxed tolerance).
    y = deep_layer_forward(x, params_bf16, out_dim, activation="relu")
    y = jax.block_until_ready(y)
    assert y.shape == (batch, out_features)
    assert jnp.allclose(y, y_ref, atol=5e-2, rtol=5e-2), "bf16 path mismatch"

    # Sigmoid path exercises the padded-lane invariant mid-stack.
    y_sig_ref = deep_layer_reference(x, params, activation="sigmoid")
    y_sig = deep_layer_forward(x, params_f32, out_dim, activation="sigmoid",
                               compute_dtype=jnp.float32)
    y_sig = jax.block_until_ready(y_sig)
    assert jnp.allclose(y_sig, y_sig_ref, atol=1e-4, rtol=1e-4), "sigmoid mismatch"

    print("KERNEL_OK")
</pallas_src>

<mosaic_0001>
module attributes {stable_mosaic.version = 11 : i64} {
  func.func @_deep_layer_kernel(%arg0: i32, %arg1: memref<8x128xf32, #tpu.memory_space<vmem>>, %arg2: memref<128x128xf32, #tpu.memory_space<vmem>>, %arg3: memref<1x128xf32, #tpu.memory_space<vmem>>, %arg4: memref<128x128xf32, #tpu.memory_space<vmem>>, %arg5: memref<1x128xf32, #tpu.memory_space<vmem>>, %arg6: memref<128x128xf32, #tpu.memory_space<vmem>>, %arg7: memref<1x128xf32, #tpu.memory_space<vmem>>, %arg8: memref<8x128xf32, #tpu.memory_space<vmem>>) attributes {dimension_semantics = [#tpu.dimension_semantics<parallel>], iteration_bounds = array<i64: 1>, scalar_prefetch = 0 : i64, scratch_operands = 0 : i64, tpu.core_type = #tpu.core_type<tc>, window_params = [{transform_indices = @transform_0, window_bounds = array<i64: 8, 128>}, {pipeline_mode = #tpu.pipeline_mode<synchronous>, transform_indices = @transform_1, window_bounds = array<i64: 128, 128>}, {pipeline_mode = #tpu.pipeline_mode<synchronous>, transform_indices = @transform_2, window_bounds = array<i64: 1, 128>}, {pipeline_mode = #tpu.pipeline_mode<synchronous>, transform_indices = @transform_3, window_bounds = array<i64: 128, 128>}, {pipeline_mode = #tpu.pipeline_mode<synchronous>, transform_indices = @transform_4, window_bounds = array<i64: 1, 128>}, {pipeline_mode = #tpu.pipeline_mode<synchronous>, transform_indices = @transform_5, window_bounds = array<i64: 128, 128>}, {pipeline_mode = #tpu.pipeline_mode<synchronous>, transform_indices = @transform_6, window_bounds = array<i64: 1, 128>}, {transform_indices = @transform_7, window_bounds = array<i64: 8, 128>}]} {
    %c0 = arith.constant 0 : index
    %c0_0 = arith.constant 0 : index
    %0 = vector.load %arg1[%c0, %c0_0] : memref<8x128xf32, #tpu.memory_space<vmem>>, vector<8x128xf32>
    %c0_1 = arith.constant 0 : index
    %c0_2 = arith.constant 0 : index
    %1 = vector.load %arg2[%c0_1, %c0_2] : memref<128x128xf32, #tpu.memory_space<vmem>>, vector<128x128xf32>
    %c0_3 = arith.constant 0 : index
    %c0_4 = arith.constant 0 : index
    %2 = vector.load %arg3[%c0_3, %c0_4] : memref<1x128xf32, #tpu.memory_space<vmem>>, vector<1x128xf32>
    %cst = arith.constant dense<0.000000e+00> : vector<8x128xf32>
    %3 = tpu.matmul %0, %1, %cst {dimension_numbers = #tpu.dot_dimension_numbers<[1], [0], [0], [1], [0, 0, 1, 1], [], []>} : vector<8x128xf32>, vector<128x128xf32>, vector<8x128xf32> -> vector<8x128xf32>
    %4 = vector.broadcast %2 : vector<1x128xf32> to vector<8x128xf32>
    %5 = arith.addf %3, %4 : vector<8x128xf32>
    %cst_5 = arith.constant 0.000000e+00 : f32
    %6 = vector.broadcast %cst_5 : f32 to vector<8x128xf32>
    %7 = arith.maximumf %5, %6 : vector<8x128xf32>
    %c0_6 = arith.constant 0 : index
    %c0_7 = arith.constant 0 : index
    %8 = vector.load %arg4[%c0_6, %c0_7] : memref<128x128xf32, #tpu.memory_space<vmem>>, vector<128x128xf32>
    %c0_8 = arith.constant 0 : index
    %c0_9 = arith.constant 0 : index
    %9 = vector.load %arg5[%c0_8, %c0_9] : memref<1x128xf32, #tpu.memory_space<vmem>>, vector<1x128xf32>
    %cst_10 = arith.constant dense<0.000000e+00> : vector<8x128xf32>
    %10 = tpu.matmul %7, %8, %cst_10 {dimension_numbers = #tpu.dot_dimension_numbers<[1], [0], [0], [1], [0, 0, 1, 1], [], []>} : vector<8x128xf32>, vector<128x128xf32>, vector<8x128xf32> -> vector<8x128xf32>
    %11 = vector.broadcast %9 : vector<1x128xf32> to vector<8x128xf32>
    %12 = arith.addf %10, %11 : vector<8x128xf32>
    %cst_11 = arith.constant 0.000000e+00 : f32
    %13 = vector.broadcast %cst_11 : f32 to vector<8x128xf32>
    %14 = arith.maximumf %12, %13 : vector<8x128xf32>
    %c0_12 = arith.constant 0 : index
    %c0_13 = arith.constant 0 : index
    %15 = vector.load %arg6[%c0_12, %c0_13] : memref<128x128xf32, #tpu.memory_space<vmem>>, vector<128x128xf32>
    %c0_14 = arith.constant 0 : index
    %c0_15 = arith.constant 0 : index
    %16 = vector.load %arg7[%c0_14, %c0_15] : memref<1x128xf32, #tpu.memory_space<vmem>>, vector<1x128xf32>
    %cst_16 = arith.constant dense<0.000000e+00> : vector<8x128xf32>
    %17 = tpu.matmul %14, %15, %cst_16 {dimension_numbers = #tpu.dot_dimension_numbers<[1], [0], [0], [1], [0, 0, 1, 1], [], []>} : vector<8x128xf32>, vector<128x128xf32>, vector<8x128xf32> -> vector<8x128xf32>
    %18 = vector.broadcast %16 : vector<1x128xf32> to vector<8x128xf32>
    %19 = arith.addf %17, %18 : vector<8x128xf32>
    %cst_17 = arith.constant 0.000000e+00 : f32
    %20 = vector.broadcast %cst_17 : f32 to vector<8x128xf32>
    %21 = arith.maximumf %19, %20 : vector<8x128xf32>
    %c0_18 = arith.constant 0 : index
    %c0_19 = arith.constant 0 : index
    %22 = vector.load %arg8[%c0_18, %c0_19] : memref<8x128xf32, #tpu.memory_space<vmem>>, vector<8x128xf32>
    tpu.vector_store %arg8[%c0_18, %c0_19], %21 {strides = array<i32>} : memref<8x128xf32, #tpu.memory_space<vmem>>, vector<8x128xf32>,
    return
  }
  func.func @transform_0(%arg0: i32) -> (i32, i32) {
    %c0_i32 = arith.constant 0 : i32
    %c0_i32_0 = arith.constant 0 : i32
    return %arg0, %c0_i32 : i32, i32
  }
  func.func @transform_1(%arg0: i32) -> (i32, i32) {
    %c0_i32 = arith.constant 0 : i32
    %c0_i32_0 = arith.constant 0 : i32
    %c0_i32_1 = arith.constant 0 : i32
    return %c0_i32, %c0_i32_0 : i32, i32
  }
  func.func @transform_2(%arg0: i32) -> (i32, i32) {
    %c0_i32 = arith.constant 0 : i32
    %c0_i32_0 = arith.constant 0 : i32
    %c0_i32_1 = arith.constant 0 : i32
    return %c0_i32, %c0_i32_0 : i32, i32
  }
  func.func @transform_3(%arg0: i32) -> (i32, i32) {
    %c0_i32 = arith.constant 0 : i32
    %c0_i32_0 = arith.constant 0 : i32
    %c0_i32_1 = arith.constant 0 : i32
    return %c0_i32, %c0_i32_0 : i32, i32
  }
  func.func @transform_4(%arg0: i32) -> (i32, i32) {
    %c0_i32 = arith.constant 0 : i32
    %c0_i32_0 = arith.constant 0 : i32
    %c0_i32_1 = arith.constant 0 : i32
    return %c0_i32, %c0_i32_0 : i32, i32
  }
  func.func @transform_5(%arg0: i32) -> (i32, i32) {
    %c0_i32 = arith.constant 0 : i32
    %c0_i32_0 = arith.constant 0 : i32
    %c0_i32_1 = arith.constant 0 : i32
    return %c0_i32, %c0_i32_0 : i32, i32
  }
  func.func @transform_6(%arg0: i32) -> (i32, i32) {
    %c0_i32 = arith.constant 0 : i32
    %c0_i32_0 = arith.constant 0 : i32
    %c0_i32_1 = arith.constant 0 : i32
    return %c0_i32, %c0_i32_0 : i32, i32
  }
  func.func @transform_7(%arg0: i32) -> (i32, i32) {
    %c0_i32 = arith.constant 0 : i32
    %c0_i32_0 = arith.constant 0 : i32
    return %arg0, %c0_i32 : i32, i32
  }
}

</mosaic_0001>

<bundles_post_ra>
// kernel: deep_layer_forward.1
= control target key start
LH: loop header
LB: loop body
LE: loop exit
PB: predicated region body
PF: predicated region fallthrough
CT: control target
= control target key end

     0   :  { %12 = vsyncpa [#allocation3], 0  ;;  %s811_s0 = inlined_call_operand.vmem [shape: f32[8,128], index: 0, kind: input, shape index: {}]   ;;  %s812_s1 = inlined_call_operand.hbm [shape: f32[128,128], index: 1, kind: input, shape index: {}]   ;;  %s813_s2 = inlined_call_operand.vmem [shape: f32[1,128], index: 2, kind: input, shape index: {}]   ;;  %s814_s3 = inlined_call_operand.hbm [shape: f32[128,128], index: 3, kind: input, shape index: {}]   ;;  %s815_s4 = inlined_call_operand.vmem [shape: f32[1,128], index: 4, kind: input, shape index: {}]   ;;  %s816_s5 = inlined_call_operand.hbm [shape: f32[128,128], index: 5, kind: input, shape index: {}]   ;;  %s817_s6 = inlined_call_operand.vmem [shape: f32[1,128], index: 6, kind: input, shape index: {}]   ;;  %s818_s7 = inlined_call_operand.vmem [shape: f32[8,128], index: 7, kind: output, shape index: {}]  }
   0x1   :  { %13 = vsyncpa [#allocation5], 0  ;;  %s666_s24 = smov [#allocation4]   ;;  %s667_s26 = smov [#allocation2]  }
   0x2   :  { %s35_s25 = sshll.u32 %s666_s24, 4  ;;  %s21_s27 = sshll.u32 %s667_s26, 4  ;;  %s36_s25 = int_to_ptr.vmem [resolvable:$true] %s35_s25  ;;  %s714_s27 = int_to_ptr.vmem [resolvable:$true] %s21_s27 }
   0x3   :  { %s596_s30 = scalar_lea.hbm %s814_s3, 2048 }
   0x4   :  { %p597_p0 = scmp.ne.s32.totalorder %s814_s3, %s596_s30  ;;  %p600_p1 = scmp.lt.u32.totalorder %s596_s30, %s814_s3 }
   0x6   :  { %p602_p2 = pnand %p600_p1, %p597_p0 }
   0x8   :  { %605 = shalt.err (!%p602_p2)
}
   0x9   :  { %s606_s12 = scalar_lea.vmem %s36_s25, 2048  ;;  %p611_p4 = scmp.lt.s32.totalorder %s36_s25, %s36_s25 }
   0xa   :  { %p607_p3 = scmp.ne.s32.totalorder %s36_s25, %s606_s12  ;;  %p612_p5 = scmp.lt.s32.totalorder %s606_s12, %s606_s12 }
   0xc   :  { %p613_p6 = por %p612_p5, %p611_p4 }
   0xe   :  { %p614_p7 = pnand %p613_p6, %p607_p3 }
  0x10   :  { %617 = shalt.err (!%p614_p7)
}
  0x11   :  { %s668_s13 = smov 128   ;;  %s669_s14 = smov 8  }
  0x12   :  { %41 = dma.hbm_to_vmem [thread:$0]  %s814_s3, 2048, %s36_s25, [#allocation5], %s668_s13, %s668_s13, %s669_s14  }
  0x13   :  { %s618_s19 = scalar_lea.hbm %s812_s1, 2048 }
  0x14   :  { %p619_p8 = scmp.ne.s32.totalorder %s812_s1, %s618_s19  ;;  %p622_p9 = scmp.lt.u32.totalorder %s618_s19, %s812_s1 }
  0x16   :  { %p624_p10 = pnand %p622_p9, %p619_p8 }
  0x18   :  { %627 = shalt.err (!%p624_p10)
}
  0x19   :  { %s628_s24 = scalar_lea.vmem %s714_s27, 2048  ;;  %p633_p12 = scmp.lt.s32.totalorder %s714_s27, %s714_s27 }
  0x1a   :  { %p629_p11 = scmp.ne.s32.totalorder %s714_s27, %s628_s24  ;;  %p634_p13 = scmp.lt.s32.totalorder %s628_s24, %s628_s24 }
  0x1c   :  { %p635_p0 = por %p634_p13, %p633_p12 }
  0x1e   :  { %p636_p1 = pnand %p635_p0, %p629_p11 }
  0x20   :  { %639 = shalt.err (!%p636_p1)
}
  0x21   :  { %27 = dma.hbm_to_vmem [thread:$0]  %s812_s1, 2048, %s714_s27, [#allocation3], %s668_s13, %s668_s13, %s669_s14  }
  0x22   :  { %s670_s26 = smov [#allocation6]   ;;  %s640_s8 = scalar_lea.hbm %s816_s5, 2048 }
  0x23   :  { %s49_s28 = sshll.u32 %s670_s26, 4  ;;  %p641_p2 = scmp.ne.s32.totalorder %s816_s5, %s640_s8  ;;  %s50_s28 = int_to_ptr.vmem [resolvable:$true] %s49_s28 }
  0x24   :  { %p644_p3 = scmp.lt.u32.totalorder %s640_s8, %s816_s5 }
  0x26   :  { %p646_p4 = pnand %p644_p3, %p641_p2 }
  0x28   :  { %649 = shalt.err (!%p646_p4)
}
  0x29   :  { %s650_s15 = scalar_lea.vmem %s50_s28, 2048  ;;  %p655_p6 = scmp.lt.s32.totalorder %s50_s28, %s50_s28 }
  0x2a   :  { %p651_p5 = scmp.ne.s32.totalorder %s50_s28, %s650_s15  ;;  %p656_p7 = scmp.lt.s32.totalorder %s650_s15, %s650_s15 }
  0x2c   :  { %p657_p8 = por %p656_p7, %p655_p6 }
  0x2e   :  { %p658_p9 = pnand %p657_p8, %p651_p5 }
  0x30   :  { %661 = shalt.err (!%p658_p9)
}
  0x31   :  { %55 = dma.hbm_to_vmem [thread:$0]  %s816_s5, 2048, %s50_s28, [#allocation5], %s668_s13, %s668_s13, %s669_s14  }
  0x32   :  { %662 = dma.done.wait [#allocation3], 2048  }
  0x33   :  { %663 = vsyncadd [#allocation3], 4294965248 }
  0x34   :  { %664 = dma.done.wait [#allocation5], 4096  }
  0x35   :  { %665 = vsyncadd [#allocation5], 4294963200  ;;  %v671_v0 = vmov 0.0|0.0   ;;  %vm672_vm0 = vmmov 0   ;;  %v673_v1 = vmov 0.0   ;;  %v68_v2 = vld [vmem:[#allocation2] sm:$0xff] }
  0x36   :  { %516 = vmatprep.subr.bf16.mxu0 %v671_v0  ;;  %443 = vmatprep.mubr.msk.f32.mxu0 %vm672_vm0, %v673_v1  ;;  %v69_v3 = vld [vmem:[#allocation2 + $0x8] sm:$0xff]  ;;  %v70_v4 = vld [vmem:[#allocation2 + $0x10] sm:$0xff]  ;;  %v71_v6 = vld [vmem:[#allocation2 + $0x18] sm:$0xff] }
  0x37   :  { %540 = vmatprep.subr.bf16.mxu1 %v671_v0  ;;  %478 = vmatprep.mubr.msk.f32.mxu1 %vm672_vm0, %v673_v1  ;;  %v517_v5 = vpack.c.bf16 %v69_v3, %v68_v2  ;;  %v520_v7 = vpack.c.bf16 %v71_v6, %v70_v4  ;;  %v72_v8 = vld [vmem:[#allocation2 + $0x20] sm:$0xff]  ;;  %v73_v9 = vld [vmem:[#allocation2 + $0x28] sm:$0xff]  ;;  %v164_v12 = vld [vmem:[#allocation4 + $0x10] sm:$0xff] }
  0x38   :  { %v162_v10 = vld [vmem:[#allocation4] sm:$0xff]  ;;  %v163_v11 = vld [vmem:[#allocation4 + $0x8] sm:$0xff]  ;;  %v165_v13 = vld [vmem:[#allocation4 + $0x18] sm:$0xff]  ;;  %v523_v14 = vpack.c.bf16 %v73_v9, %v72_v8 }
  0x39   :  { %518 = vmatpush3.bf16.msra.mxu0 %v517_v5  ;;  %v541_v15 = vpack.c.bf16 %v163_v11, %v162_v10  ;;  %v74_v16 = vld [vmem:[#allocation2 + $0x30] sm:$0xff]  ;;  %v75_v17 = vld [vmem:[#allocation2 + $0x38] sm:$0xff]  ;;  %v544_v18 = vpack.c.bf16 %v165_v13, %v164_v12  ;;  %v166_v19 = vld [vmem:[#allocation4 + $0x20] sm:$0xff] }
  0x3a   :  { %519 = vmatprep.subr.bf16.mxu0 %v671_v0  ;;  %v167_v20 = vld [vmem:[#allocation4 + $0x28] sm:$0xff]  ;;  %v526_v21 = vpack.c.bf16 %v75_v17, %v74_v16  ;;  %v76_v22 = vld [vmem:[#allocation2 + $0x40] sm:$0xff]  ;;  %v168_v25 = vld [vmem:[#allocation4 + $0x30] sm:$0xff] }
  0x3b   :  { %542 = vmatpush3.bf16.msra.mxu1 %v541_v15  ;;  %v77_v23 = vld [vmem:[#allocation2 + $0x48] sm:$0xff]  ;;  %v547_v24 = vpack.c.bf16 %v167_v20, %v166_v19  ;;  %v169_v26 = vld [vmem:[#allocation4 + $0x38] sm:$0xff]  ;;  %v78_v28 = vld [vmem:[#allocation2 + $0x50] sm:$0xff] }
  0x3c   :  { %543 = vmatprep.subr.bf16.mxu1 %v671_v0  ;;  %v529_v27 = vpack.c.bf16 %v77_v23, %v76_v22  ;;  %v79_v29 = vld [vmem:[#allocation2 + $0x58] sm:$0xff]  ;;  %v550_v30 = vpack.c.bf16 %v169_v26, %v168_v25  ;;  %v170_v31 = vld [vmem:[#allocation4 + $0x40] sm:$0xff]  ;;  %v171_v32 = vld [vmem:[#allocation4 + $0x48] sm:$0xff] }
  0x3d   :  { %521 = vmatpush3.bf16.msra.mxu0 %v520_v7  ;;  %v532_v33 = vpack.c.bf16 %v79_v29, %v78_v28  ;;  %v80_v34 = vld [vmem:[#allocation2 + $0x60] sm:$0xff]  ;;  %v81_v35 = vld [vmem:[#allocation2 + $0x68] sm:$0xff]  ;;  %v553_v36 = vpack.c.bf16 %v171_v32, %v170_v31  ;;  %v172_v37 = vld [vmem:[#allocation4 + $0x50] sm:$0xff] }
  0x3e   :  { %522 = vmatprep.subr.bf16.mxu0 %v671_v0  ;;  %v173_v38 = vld [vmem:[#allocation4 + $0x58] sm:$0xff]  ;;  %v535_v39 = vpack.c.bf16 %v81_v35, %v80_v34  ;;  %v82_v40 = vld [vmem:[#allocation2 + $0x70] sm:$0xff]  ;;  %v174_v43 = vld [vmem:[#allocation4 + $0x60] sm:$0xff] }
  0x3f   :  { %545 = vmatpush3.bf16.msra.mxu1 %v544_v18  ;;  %v83_v41 = vld [vmem:[#allocation2 + $0x78] sm:$0xff]  ;;  %v556_v42 = vpack.c.bf16 %v173_v38, %v172_v37  ;;  %v175_v44 = vld [vmem:[#allocation4 + $0x68] sm:$0xff]  ;;  %v67_v47 = vld [vmem:[%s811_s0] sm:$0xff] }
  0x40   :  { %546 = vmatprep.subr.bf16.mxu1 %v671_v0  ;;  %v538_v45 = vpack.c.bf16 %v83_v41, %v82_v40  ;;  %v559_v46 = vpack.c.bf16 %v175_v44, %v174_v43  ;;  %v176_v48 = vld [vmem:[#allocation4 + $0x70] sm:$0xff]  ;;  %v177_v49 = vld [vmem:[#allocation4 + $0x78] sm:$0xff]  ;;  %v256_v51 = vld [vmem:[#allocation6] sm:$0xff] }
  0x41   :  { %524 = vmatpush3.bf16.msra.mxu0 %v523_v14  ;;  %v562_v50 = vpack.c.bf16 %v177_v49, %v176_v48  ;;  %v257_v52 = vld [vmem:[#allocation6 + $0x8] sm:$0xff]  ;;  %v258_v53 = vld [vmem:[#allocation6 + $0x10] sm:$0xff]  ;;  %v259_v55 = vld [vmem:[#allocation6 + $0x18] sm:$0xff] }
  0x42   :  { %525 = vmatprep.subr.bf16.mxu0 %v671_v0  ;;  %v565_v54 = vpack.c.bf16 %v257_v52, %v256_v51  ;;  %v568_v56 = vpack.c.bf16 %v259_v55, %v258_v53  ;;  %v260_v57 = vld [vmem:[#allocation6 + $0x20] sm:$0xff]  ;;  %v261_v58 = vld [vmem:[#allocation6 + $0x28] sm:$0xff]  ;;  %v262_v60 = vld [vmem:[#allocation6 + $0x30] sm:$0xff] }
  0x43   :  { %548 = vmatpush3.bf16.msra.mxu1 %v547_v24  ;;  %v571_v59 = vpack.c.bf16 %v261_v58, %v260_v57  ;;  %v263_v61 = vld [vmem:[#allocation6 + $0x38] sm:$0xff]  ;;  %v264_v63 = vld [vmem:[#allocation6 + $0x40] sm:$0xff]  ;;  %v266_v3 = vld [vmem:[#allocation6 + $0x50] sm:$0xff] }
  0x44   :  { %549 = vmatprep.subr.bf16.mxu1 %v671_v0  ;;  %v574_v62 = vpack.c.bf16 %v263_v61, %v262_v60  ;;  %v267_v4 = vld [vmem:[#allocation6 + $0x58] sm:$0xff]  ;;  %v268_v6 = vld [vmem:[#allocation6 + $0x60] sm:$0xff]  ;;  %v269_v7 = vld [vmem:[#allocation6 + $0x68] sm:$0xff] }
  0x45   :  { %527 = vmatpush3.bf16.msra.mxu0 %v526_v21  ;;  %v580_v5 = vpack.c.bf16 %v267_v4, %v266_v3  ;;  %v583_v8 = vpack.c.bf16 %v269_v7, %v268_v6  ;;  %v357_v9 = vld [vmem:[%s813_s2] ss:$0 sm:$0xff]  ;;  %v270_v14 = vld [vmem:[#allocation6 + $0x70] sm:$0xff]  ;;  %v271_v15 = vld [vmem:[#allocation6 + $0x78] sm:$0xff] }
  0x46   :  { %528 = vmatprep.subr.bf16.mxu0 %v671_v0  ;;  %v586_v16 = vpack.c.bf16 %v271_v15, %v270_v14  ;;  %v358_v17 = vld [vmem:[%s815_s4] ss:$0 sm:$0xff] }
  0x47   :  { %551 = vmatpush3.bf16.msra.mxu1 %v550_v30  ;;  %v359_v21 = vld [vmem:[%s817_s6] ss:$0 sm:$0xff] }
  0x48   :  { %552 = vmatprep.subr.bf16.mxu1 %v671_v0 }
  0x49   :  { %530 = vmatpush3.bf16.msra.mxu0 %v529_v27 }
  0x4a   :  { %531 = vmatprep.subr.bf16.mxu0 %v671_v0 }
  0x4b   :  { %554 = vmatpush3.bf16.msra.mxu1 %v553_v36 }
  0x4c   :  { %555 = vmatprep.subr.bf16.mxu1 %v671_v0 }
  0x4d   :  { %533 = vmatpush3.bf16.msra.mxu0 %v532_v33 }
  0x4e   :  { %534 = vmatprep.subr.bf16.mxu0 %v671_v0 }
  0x4f   :  { %557 = vmatpush3.bf16.msra.mxu1 %v556_v42 }
  0x50   :  { %558 = vmatprep.subr.bf16.mxu1 %v671_v0 }
  0x51   :  { %536 = vmatpush3.bf16.msra.mxu0 %v535_v39 }
  0x52   :  { %537 = vmatprep.subr.bf16.mxu0 %v671_v0 }
  0x53   :  { %560 = vmatpush3.bf16.msra.mxu1 %v559_v46 }
  0x54   :  { %561 = vmatprep.subr.bf16.mxu1 %v671_v0 }
  0x55   :  { %539 = vmatpush3.bf16.msra.mxu0 %v538_v45 }
  0x56   :  { %564 = vmatprep.subr.bf16.mxu0 %v671_v0 }
  0x57   :  { %563 = vmatpush3.bf16.msra.mxu1 %v562_v50 }
  0x58   :  { %444 = vmatmul.mubr.f32.vlgmr.msra.gmra.mrb[0].mxu0 %v67_v47 }
  0x59   :  { %513 = vmatprep.mubr.msk.f32.mxu0 %vm672_vm0, %v673_v1  ;;  %566 = vmatpush3.bf16.msra.mxu0 %v565_v54  ;;  %v265_v1 = vld [vmem:[#allocation6 + $0x48] sm:$0xff] }
  0x5a   :  { %567 = vmatprep.subr.bf16.mxu0 %v671_v0  ;;  %v577_v2 = vpack.c.bf16 %v265_v1, %v264_v63 }
  0x5d   :  { %569 = vmatpush3.bf16.msra.mxu0 %v568_v56 }
  0x5e   :  { %570 = vmatprep.subr.bf16.mxu0 %v671_v0 }
  0x61   :  { %572 = vmatpush3.bf16.msra.mxu0 %v571_v59 }
  0x62   :  { %573 = vmatprep.subr.bf16.mxu0 %v671_v0 }
  0x65   :  { %575 = vmatpush3.bf16.msra.mxu0 %v574_v62 }
  0x66   :  { %576 = vmatprep.subr.bf16.mxu0 %v671_v0 }
  0x69   :  { %578 = vmatpush3.bf16.msra.mxu0 %v577_v2 }
  0x6a   :  { %579 = vmatprep.subr.bf16.mxu0 %v671_v0 }
  0x6d   :  { %581 = vmatpush3.bf16.msra.mxu0 %v580_v5 }
  0x6e   :  { %582 = vmatprep.subr.bf16.mxu0 %v671_v0 }
  0x71   :  { %584 = vmatpush3.bf16.msra.mxu0 %v583_v8 }
  0x72   :  { %585 = vmatprep.subr.bf16.mxu0 %v671_v0 }
  0x75   :  { %587 = vmatpush3.bf16.msra.mxu0 %v586_v16 }
 0x12b   :  { %v157_v10 = vpop.f32.mrb[0].mxu0 }
 0x12c   :  { %v158_v11 = vadd.f32 %v357_v9, %v157_v10  ;;  %v445_v12 = vpop.f32.mrb[1].mxu0 }
 0x12e   :  { %v161_v13 = vmax.f32 %v158_v11, 0.0 }
 0x130   :  { %479 = vmatmul.mubr.f32.vlgmr.msra.gmra.mrb[0].mxu1 %v161_v13 }
 0x203   :  { %v251_v18 = vpop.f32.mrb[0].mxu1 }
 0x204   :  { %v252_v19 = vadd.f32 %v358_v17, %v251_v18  ;;  %v480_v0 = vpop.f32.mrb[1].mxu1 }
 0x206   :  { %v255_v20 = vmax.f32 %v252_v19, 0.0 }
 0x208   :  { %514 = vmatmul.mubr.f32.vlgmr.msra.gmra.mrb[2].mxu0 %v255_v20 }
 0x2db   :  { %v345_v22 = vpop.f32.mrb[2].mxu0 }
 0x2dc   :  { %v346_v23 = vadd.f32 %v359_v21, %v345_v22  ;;  %v515_v24 = vpop.f32.mrb[3].mxu0 }
 0x2de   :  { %v349_v25 = vmax.f32 %v346_v23, 0.0 }
 0x2e0   :  { %350 = vst [vmem:[%s818_s7] sm:$0xff] %v349_v25 }
 0x2e1   :  { %355 = vsyncpa [#allocation3], 1 }
 0x2e2   :  { %356 = vsyncpa [#allocation5], 1 }

</bundles_post_ra>
